<compile_context>
chip_gen: v7x
topology: tpu7x:2x2x1
jax: 0.10.0
libtpu: 0.0.40
codegen_flags: <defaults>
</compile_context>

<pallas_src>
import functools
import math

import jax
import jax.numpy as jnp
from jax.experimental import pallas as pl
from jax.experimental.pallas import tpu as pltpu


_LANE_DENSE_MIN_B = 128   # switch to the transposed lane-dense path at this batch size


def _round_up(a, m):
    return ((a + m - 1) // m) * m


# ----------------------------------------------------------------------------
# Kernel A: small batch, row layout (B rows on sublanes, features on lanes).
# ----------------------------------------------------------------------------
def _head_kernel_rows(x_ref, w_ref, b_ref, out_ref, *,
                      out_dim, inv_temperature, clamp_lo, clamp_hi):
    f32 = jnp.float32
    # bf16/f32 operands straight into the MXU, f32 accumulate.
    h = jnp.dot(x_ref[...], w_ref[...], preferred_element_type=f32) + b_ref[...]  # (B, 2E)

    # Clamp only the logvar lanes; slab stays contiguous (no concatenate).
    lane = jax.lax.broadcasted_iota(jnp.int32, h.shape, 1)
    h_clamped = jnp.where(lane >= out_dim, jnp.clip(h, clamp_lo, clamp_hi), h)

    # Temperature softmax over the mu lanes [0, E).
    scaled = h[:, :out_dim] * inv_temperature
    scaled = scaled - jnp.max(scaled, axis=-1, keepdims=True)
    e = jnp.exp(scaled)
    probs = e * pl.reciprocal(jnp.sum(e, axis=-1, keepdims=True), approx=False)

    out_ref[:, : 2 * out_dim] = h_clamped.astype(out_ref.dtype)
    out_ref[:, 2 * out_dim:] = probs.astype(out_ref.dtype)


# ----------------------------------------------------------------------------
# Kernel B: large batch, lane-dense transposed layout (batch on lanes).
# ----------------------------------------------------------------------------
def _head_kernel_lane_dense(x_ref, w_ref, b_ref, out_ref, *,
                            out_dim, inv_temperature, clamp_lo, clamp_hi):
    f32 = jnp.float32
    # (2E, D) contracted with (tb, D) along D  ->  (2E, tb): batch on the lane axis.
    h = jax.lax.dot_general(
        w_ref[...], x_ref[...],
        dimension_numbers=(((1,), (1,)), ((), ())),
        preferred_element_type=f32,
    ) + b_ref[...]                                                     # (2E, tb)

    # Clamp only the logvar sublanes [E, 2E).
    row = jax.lax.broadcasted_iota(jnp.int32, h.shape, 0)
    h_clamped = jnp.where(row >= out_dim, jnp.clip(h, clamp_lo, clamp_hi), h)

    # Temperature softmax over the E mu sublanes; batch stays lane-dense.
    scaled = h[:out_dim, :] * inv_temperature
    scaled = scaled - jnp.max(scaled, axis=0, keepdims=True)
    e = jnp.exp(scaled)
    probs = e * pl.reciprocal(jnp.sum(e, axis=0, keepdims=True), approx=False)

    out_ref[: 2 * out_dim, :] = h_clamped.astype(out_ref.dtype)
    out_ref[2 * out_dim:, :] = probs.astype(out_ref.dtype)


# ----------------------------------------------------------------------------
# One-time parameter packing (hoisted out of the per-call wrapper).
# ----------------------------------------------------------------------------
def pack_params(w_mu, b_mu, w_lv, b_lv, *, compute_dtype=jnp.float32):
    """Pack once at init time.  Returns both layouts used by the two paths."""
    w_col = jnp.concatenate([w_mu, w_lv], axis=0).astype(compute_dtype)   # (2E, D)
    w_row = w_col.T                                                       # (D, 2E)
    b = jnp.concatenate([b_mu, b_lv], axis=0).astype(jnp.float32)
    return dict(
        w_row=w_row,                # (D, 2E)  for the row-layout kernel
        w_col=w_col,                # (2E, D)  for the lane-dense kernel
        b_row=b[None, :],           # (1, 2E)
        b_col=b[:, None],           # (2E, 1)
        out_dim=int(w_mu.shape[0]),
        compute_dtype=jnp.dtype(compute_dtype),
    )


# ----------------------------------------------------------------------------
# Forward wrapper
# ----------------------------------------------------------------------------
def emotion_uncertainty_head_v4(x, params, *, temperature=1.5,
                                clamp_range=(-3.0, 3.0), block_b=256):
    """x: (B, D).  params: from pack_params().  Returns (mu, logvar, probs), f32 (B, E)."""
    B, D = x.shape
    E = params["out_dim"]
    compute_dtype = params["compute_dtype"]
    if x.dtype != compute_dtype:
        # Callers should pass x already in the compute dtype to avoid this cast.
        x = x.astype(compute_dtype)

    inv_t = 1.0 / float(temperature)
    lo, hi = float(clamp_range[0]), float(clamp_range[1])

    if B < _LANE_DENSE_MIN_B:
        # --- small batch: single block, row layout, grid=(1,) ---
        w, b = params["w_row"], params["b_row"]
        kernel = functools.partial(_head_kernel_rows, out_dim=E,
                                   inv_temperature=inv_t, clamp_lo=lo, clamp_hi=hi)
        out_nbytes = B * 3 * E * 4
        out = pl.pallas_call(
            kernel,
            grid=(1,),
            in_specs=[
                pl.BlockSpec((B, D), lambda i: (0, 0)),
                pl.BlockSpec((D, 2 * E), lambda i: (0, 0)),
                pl.BlockSpec((1, 2 * E), lambda i: (0, 0)),
            ],
            out_specs=pl.BlockSpec((B, 3 * E), lambda i: (0, 0)),
            out_shape=jax.ShapeDtypeStruct((B, 3 * E), jnp.float32),
            compiler_params=pltpu.CompilerParams(dimension_semantics=("parallel",)),
            cost_estimate=pl.CostEstimate(
                flops=2 * B * D * (2 * E),
                transcendentals=B * E,
                bytes_accessed=int(x.nbytes + w.nbytes + b.nbytes + out_nbytes)),
        )(x, w, b)
        mu = out[:, :E]
        logvar = out[:, E:2 * E]
        probs = out[:, 2 * E:]
        return mu, logvar, probs

    # --- large batch: lane-dense transposed layout, B tiled along lanes ---
    w, b = params["w_col"], params["b_col"]
    tb = block_b                       # multiple of 256: full MXU lane fill on v6e/v7x
    Bp = _round_up(B, tb)
    if Bp != B:
        x = jnp.pad(x, ((0, Bp - B), (0, 0)))

    kernel = functools.partial(_head_kernel_lane_dense, out_dim=E,
                               inv_temperature=inv_t, clamp_lo=lo, clamp_hi=hi)
    out_nbytes = Bp * 3 * E * 4
    out_t = pl.pallas_call(
        kernel,
        grid=(Bp // tb,),
        in_specs=[
            pl.BlockSpec((tb, D), lambda i: (i, 0)),      # batch tile
            pl.BlockSpec((2 * E, D), lambda i: (0, 0)),   # weights VMEM-resident
            pl.BlockSpec((2 * E, 1), lambda i: (0, 0)),
        ],
        out_specs=pl.BlockSpec((3 * E, tb), lambda i: (0, i)),  # batch on lanes: unmasked stores
        out_shape=jax.ShapeDtypeStruct((3 * E, Bp), jnp.float32),
        compiler_params=pltpu.CompilerParams(dimension_semantics=("parallel",)),
        cost_estimate=pl.CostEstimate(
            flops=2 * Bp * D * (2 * E),
            transcendentals=Bp * E,
            bytes_accessed=int(x.nbytes + w.nbytes + b.nbytes + out_nbytes)),
    )(x, w, b)

    out = out_t[:, :B].T               # single (3E, B) -> (B, 3E) relayout in the wrapper
    mu = out[:, :E]
    logvar = out[:, E:2 * E]
    probs = out[:, 2 * E:]
    return mu, logvar, probs


# ----------------------------------------------------------------------------
# Deterministic parameter construction (mirrors the module __init__)
# ----------------------------------------------------------------------------
def init_params(key, *, input_dim, output_dim):
    k_mu, k_lv = jax.random.split(key, 2)

    def xavier_uniform(k, shape, gain):
        fan_out, fan_in = shape
        bound = gain * math.sqrt(6.0 / (fan_in + fan_out))
        return jax.random.uniform(k, shape, jnp.float32, -bound, bound)

    w_mu = xavier_uniform(k_mu, (output_dim, input_dim), gain=0.5)
    b_mu = jnp.zeros((output_dim,), jnp.float32)
    w_lv = xavier_uniform(k_lv, (output_dim, input_dim), gain=0.1)
    b_lv = jnp.full((output_dim,), -1.0, jnp.float32)
    return w_mu, b_mu, w_lv, b_lv


# ----------------------------------------------------------------------------
# Pure-JAX reference (for correctness check)
# ----------------------------------------------------------------------------
def reference_forward(x, w_mu, b_mu, w_lv, b_lv, *, temperature=1.5, clamp_range=(-3.0, 3.0)):
    hp = jax.lax.Precision.HIGHEST
    mu = jnp.dot(x, w_mu.T, precision=hp) + b_mu
    logvar = jnp.clip(jnp.dot(x, w_lv.T, precision=hp) + b_lv, clamp_range[0], clamp_range[1])
    probs = jax.nn.softmax(mu / temperature, axis=-1)
    return mu, logvar, probs


if __name__ == "__main__":
    key = jax.random.PRNGKey(0)
    k_x1, k_x2, k_p1, k_p2 = jax.random.split(key, 4)

    # ---- Case 1: tiny batch (row-layout path, f32), module-sized shapes ----
    B1, D1, E1 = 2, 32, 8
    w_mu, b_mu, w_lv, b_lv = init_params(k_p1, input_dim=D1, output_dim=E1)
    params1 = pack_params(w_mu, b_mu, w_lv, b_lv, compute_dtype=jnp.float32)
    x1 = jax.random.normal(k_x1, (B1, D1), jnp.float32)

    mu1, lv1, pr1 = jax.block_until_ready(emotion_uncertainty_head_v4(x1, params1))
    mu1_r, lv1_r, pr1_r = reference_forward(x1, w_mu, b_mu, w_lv, b_lv)

    assert mu1.shape == (B1, E1) and lv1.shape == (B1, E1) and pr1.shape == (B1, E1)
    assert bool(jnp.all(jnp.isfinite(mu1))) and bool(jnp.all(jnp.isfinite(lv1)))
    assert bool(jnp.all(jnp.isfinite(pr1)))
    assert bool(jnp.all(lv1 >= -3.0)) and bool(jnp.all(lv1 <= 3.0))
    assert bool(jnp.allclose(jnp.sum(pr1, axis=-1), 1.0, atol=1e-3))
    assert bool(jnp.allclose(mu1, mu1_r, rtol=5e-3, atol=5e-3))
    assert bool(jnp.allclose(lv1, lv1_r, rtol=5e-3, atol=5e-3))
    assert bool(jnp.allclose(pr1, pr1_r, rtol=5e-3, atol=5e-3))

    # ---- Case 2: larger batch (lane-dense transposed path), f32 operands ----
    B2, D2, E2 = 600, 128, 8
    w_mu2, b_mu2, w_lv2, b_lv2 = init_params(k_p2, input_dim=D2, output_dim=E2)
    x2 = jax.random.normal(k_x2, (B2, D2), jnp.float32)

    params2_f32 = pack_params(w_mu2, b_mu2, w_lv2, b_lv2, compute_dtype=jnp.float32)
    mu2, lv2, pr2 = jax.block_until_ready(emotion_uncertainty_head_v4(x2, params2_f32))
    mu2_r, lv2_r, pr2_r = reference_forward(x2, w_mu2, b_mu2, w_lv2, b_lv2)
    assert mu2.shape == (B2, E2) and lv2.shape == (B2, E2) and pr2.shape == (B2, E2)
    assert bool(jnp.all(lv2 >= -3.0)) and bool(jnp.all(lv2 <= 3.0))
    assert bool(jnp.allclose(jnp.sum(pr2, axis=-1), 1.0, atol=1e-3))
    assert bool(jnp.allclose(mu2, mu2_r, rtol=1e-2, atol=1e-2))
    assert bool(jnp.allclose(lv2, lv2_r, rtol=1e-2, atol=1e-2))
    assert bool(jnp.allclose(pr2, pr2_r, rtol=1e-2, atol=1e-2))

    # ---- Case 3: same, bf16 MXU operands (f32 accumulate); reference on bf16-rounded values ----
    params2_bf16 = pack_params(w_mu2, b_mu2, w_lv2, b_lv2, compute_dtype=jnp.bfloat16)
    x2_bf16 = x2.astype(jnp.bfloat16)
    mu3, lv3, pr3 = jax.block_until_ready(emotion_uncertainty_head_v4(x2_bf16, params2_bf16))
    mu3_r, lv3_r, pr3_r = reference_forward(
        x2_bf16.astype(jnp.float32),
        w_mu2.astype(jnp.bfloat16).astype(jnp.float32), b_mu2,
        w_lv2.astype(jnp.bfloat16).astype(jnp.float32), b_lv2)
    assert bool(jnp.all(jnp.isfinite(mu3))) and bool(jnp.all(jnp.isfinite(pr3)))
    assert bool(jnp.allclose(jnp.sum(pr3, axis=-1), 1.0, atol=1e-3))
    assert bool(jnp.allclose(mu3, mu3_r, rtol=3e-2, atol=3e-2))
    assert bool(jnp.allclose(lv3, lv3_r, rtol=3e-2, atol=3e-2))
    assert bool(jnp.allclose(pr3, pr3_r, rtol=3e-2, atol=3e-2))

    print("KERNEL_OK")
</pallas_src>

<mosaic_0001>
module attributes {stable_mosaic.version = 11 : i64} {
  func.func @_head_kernel_rows(%arg0: i32, %arg1: memref<2x32xf32, #tpu.memory_space<vmem>>, %arg2: memref<32x16xf32, #tpu.memory_space<vmem>>, %arg3: memref<1x16xf32, #tpu.memory_space<vmem>>, %arg4: memref<2x24xf32, #tpu.memory_space<vmem>>) attributes {dimension_semantics = [#tpu.dimension_semantics<parallel>], iteration_bounds = array<i64: 1>, scalar_prefetch = 0 : i64, scratch_operands = 0 : i64, tpu.core_type = #tpu.core_type<tc>, window_params = [{pipeline_mode = #tpu.pipeline_mode<synchronous>, transform_indices = @transform_0, window_bounds = array<i64: 2, 32>}, {pipeline_mode = #tpu.pipeline_mode<synchronous>, transform_indices = @transform_1, window_bounds = array<i64: 32, 16>}, {pipeline_mode = #tpu.pipeline_mode<synchronous>, transform_indices = @transform_2, window_bounds = array<i64: 1, 16>}, {pipeline_mode = #tpu.pipeline_mode<synchronous>, transform_indices = @transform_3, window_bounds = array<i64: 2, 24>}]} {
    %c0 = arith.constant 0 : index
    %c0_0 = arith.constant 0 : index
    %0 = vector.load %arg1[%c0, %c0_0] : memref<2x32xf32, #tpu.memory_space<vmem>>, vector<2x32xf32>
    %c0_1 = arith.constant 0 : index
    %c0_2 = arith.constant 0 : index
    %1 = vector.load %arg2[%c0_1, %c0_2] : memref<32x16xf32, #tpu.memory_space<vmem>>, vector<32x16xf32>
    %cst = arith.constant dense<0.000000e+00> : vector<2x16xf32>
    %2 = tpu.matmul %0, %1, %cst {dimension_numbers = #tpu.dot_dimension_numbers<[1], [0], [0], [1], [0, 0, 1, 1], [], []>} : vector<2x32xf32>, vector<32x16xf32>, vector<2x16xf32> -> vector<2x16xf32>
    %c0_3 = arith.constant 0 : index
    %c0_4 = arith.constant 0 : index
    %3 = vector.load %arg3[%c0_3, %c0_4] : memref<1x16xf32, #tpu.memory_space<vmem>>, vector<1x16xf32>
    %4 = vector.broadcast %3 : vector<1x16xf32> to vector<2x16xf32>
    %5 = arith.addf %2, %4 : vector<2x16xf32>
    %6 = tpu.iota {dimensions = array<i32: 1>} : vector<2x16xi32>
    %c8_i32 = arith.constant 8 : i32
    %7 = vector.broadcast %c8_i32 : i32 to vector<2x16xi32>
    %8 = arith.cmpi sge, %6, %7 : vector<2x16xi32>
    %cst_5 = arith.constant -3.000000e+00 : f32
    %cst_6 = arith.constant 3.000000e+00 : f32
    %9 = vector.broadcast %cst_5 : f32 to vector<2x16xf32>
    %10 = arith.maximumf %9, %5 : vector<2x16xf32>
    %11 = vector.broadcast %cst_6 : f32 to vector<2x16xf32>
    %12 = arith.minimumf %11, %10 : vector<2x16xf32>
    %13 = arith.select %8, %12, %5 : vector<2x16xi1>, vector<2x16xf32>
    %14 = vector.extract_strided_slice %5 {offsets = [0, 0], sizes = [2, 8], strides = [1, 1]} : vector<2x16xf32> to vector<2x8xf32>
    %cst_7 = arith.constant 0.666666686 : f32
    %15 = vector.broadcast %cst_7 : f32 to vector<2x8xf32>
    %16 = arith.mulf %14, %15 : vector<2x8xf32>
    %cst_8 = arith.constant dense<0xFF800000> : vector<2xf32>
    %17 = vector.multi_reduction <maximumf>, %16, %cst_8 [1] : vector<2x8xf32> to vector<2xf32>
    %18 = vector.shape_cast %17 : vector<2xf32> to vector<2x1xf32>
    %19 = vector.broadcast %18 : vector<2x1xf32> to vector<2x8xf32>
    %20 = arith.subf %16, %19 : vector<2x8xf32>
    %21 = math.exp %20 : vector<2x8xf32>
    %cst_9 = arith.constant dense<0.000000e+00> : vector<2xf32>
    %22 = vector.multi_reduction <add>, %21, %cst_9 [1] : vector<2x8xf32> to vector<2xf32>
    %23 = vector.shape_cast %22 : vector<2xf32> to vector<2x1xf32>
    %24 = tpu.reciprocal %23 : vector<2x1xf32> -> vector<2x1xf32>
    %25 = vector.broadcast %24 : vector<2x1xf32> to vector<2x8xf32>
    %26 = arith.mulf %21, %25 : vector<2x8xf32>
    %c0_10 = arith.constant 0 : index
    %c0_11 = arith.constant 0 : index
    %27 = vector.load %arg4[%c0_10, %c0_11] : memref<2x24xf32, #tpu.memory_space<vmem>>, vector<2x16xf32>
    tpu.vector_store %arg4[%c0_10, %c0_11], %13 {strides = array<i32>} : memref<2x24xf32, #tpu.memory_space<vmem>>, vector<2x16xf32>,
    %c0_12 = arith.constant 0 : index
    %c16 = arith.constant 16 : index
    %28 = vector.load %arg4[%c0_12, %c16] : memref<2x24xf32, #tpu.memory_space<vmem>>, vector<2x8xf32>
    tpu.vector_store %arg4[%c0_12, %c16], %26 {strides = array<i32>} : memref<2x24xf32, #tpu.memory_space<vmem>>, vector<2x8xf32>,
    return
  }
  func.func @transform_0(%arg0: i32) -> (i32, i32) {
    %c0_i32 = arith.constant 0 : i32
    %c0_i32_0 = arith.constant 0 : i32
    %c0_i32_1 = arith.constant 0 : i32
    return %c0_i32, %c0_i32_0 : i32, i32
  }
  func.func @transform_1(%arg0: i32) -> (i32, i32) {
    %c0_i32 = arith.constant 0 : i32
    %c0_i32_0 = arith.constant 0 : i32
    %c0_i32_1 = arith.constant 0 : i32
    return %c0_i32, %c0_i32_0 : i32, i32
  }
  func.func @transform_2(%arg0: i32) -> (i32, i32) {
    %c0_i32 = arith.constant 0 : i32
    %c0_i32_0 = arith.constant 0 : i32
    %c0_i32_1 = arith.constant 0 : i32
    return %c0_i32, %c0_i32_0 : i32, i32
  }
  func.func @transform_3(%arg0: i32) -> (i32, i32) {
    %c0_i32 = arith.constant 0 : i32
    %c0_i32_0 = arith.constant 0 : i32
    %c0_i32_1 = arith.constant 0 : i32
    return %c0_i32, %c0_i32_0 : i32, i32
  }
}

</mosaic_0001>

<bundles_post_ra>
// kernel: tpu_custom_call.1
= control target key start
LH: loop header
LB: loop body
LE: loop exit
PB: predicated region body
PF: predicated region fallthrough
CT: control target
= control target key end

     0   :  { %v200_v3 = vmov 0.0|0.0   ;;  %vm201_vm0 = vmmov 0   ;;  %v202_v6 = vmov 0.0   ;;  %s255_s0 = inlined_call_operand.vmem [shape: f32[2,32], index: 0, kind: input, shape index: {}]   ;;  %s256_s1 = inlined_call_operand.vmem [shape: f32[32,16], index: 1, kind: input, shape index: {}]   ;;  %s257_s2 = inlined_call_operand.vmem [shape: f32[1,16], index: 2, kind: input, shape index: {}]   ;;  %s258_s3 = inlined_call_operand.hbm [shape: f32[2,24], index: 3, kind: output, shape index: {}]  }
   0x1   :  { %v16_v0 = vld [vmem:[%s256_s1] sm:$0xff]  ;;  %v17_v1 = vld [vmem:[%s256_s1 + $0x8] sm:$0xff]  ;;  %v18_v2 = vld [vmem:[%s256_s1 + $0x10] sm:$0xff]  ;;  %161 = vmatprep.subr.bf16.mxu0 %v200_v3  ;;  %158 = vmatprep.mubr.msk.f32.mxu0 %vm201_vm0, %v202_v6 }
   0x2   :  { %v162_v4 = vpack.c.bf16 %v17_v1, %v16_v0  ;;  %v19_v5 = vld [vmem:[%s256_s1 + $0x18] sm:$0xff] }
   0x3   :  { %8 = vsyncpa [#allocation3], 0  ;;  %v165_v7 = vpack.c.bf16 %v19_v5, %v18_v2  ;;  %v15_v8 = vld [vmem:[%s255_s0] sm:$0x3]  ;;  %vm27_vm1 = vcmask 261120   ;;  %v101_v9 = vlaneseq  ;;  %vm108_vm2 = vcmask 58368  }
   0x4   :  { %163 = vmatpush3.bf16.msra.mxu0 %v162_v4  ;;  %v142_v10 = vld [vmem:[%s257_s2] ss:$0 sm:$0xff]  ;;  %vm120_vm4 = vcmask 123904   ;;  %s203_s0 = smov 16   ;;  %s204_s1 = smov [#allocation2]   ;;  %vm126_vm5 = vcmask 189568  }
   0x5   :  { %164 = vmatprep.subr.bf16.mxu0 %v200_v3  ;;  %v102_v11 = vand.u32 127, %v101_v9  ;;  %s134_s2 = sshll.u32 %s204_s1, 4  ;;  %s135_s2 = int_to_ptr.vmem [resolvable:$true] %s134_s2 }
   0x6   :  { %s176_s24 = scalar_lea.vmem %s135_s2, 32  ;;  %p181_p1 = scmp.lt.s32.totalorder %s135_s2, %s135_s2 }
   0x7   :  { %vm103_vm3 = vcmp.ge.s32.totalorder %v102_v11, 8  ;;  %p177_p0 = scmp.ne.s32.totalorder %s135_s2, %s176_s24  ;;  %p182_p2 = scmp.lt.s32.totalorder %s176_s24, %s176_s24 }
   0x8   :  { %166 = vmatpush3.bf16.msra.mxu0 %v165_v7 }
   0x9   :  { %p183_p3 = por %p182_p2, %p181_p1 }
   0xb   :  { %159 = vmatmul.mubr.msk.f32.vlgmr.msra.gmra.mrb[0].mxu0 %vm27_vm1, %v15_v8  ;;  %p184_p4 = pnand %p183_p3, %p177_p0 }
  0xde   :  { %v97_v12 = vpop.f32.mrb[0].mxu0 }
  0xdf   :  { %v98_v13 = vadd.f32 %v142_v10, %v97_v12  ;;  %v160_v14 = vpop.f32.mrb[1].mxu0 }
  0xe1   :  { %v144_v15 = vclamps-f32 %v98_v13, 3.0  ;;  %v107_v16 = vmul.f32 0.6666667, %v98_v13 }
  0xe3   :  { %v109_v17 = vsel %vm108_vm2, %v107_v16, -inf  ;;  %v106_v18 = vsel %vm103_vm3, %v144_v15, %v98_v13 }
  0xe4   :  { %110 = vmax.xlane.f32.xlu0 %v109_v17  ;;  %121 = vst.msk [vmem:[#allocation2] sm:$0x3] %vm120_vm4, %v106_v18 }
 0x171   :  { %v111_v19 = vpop.xlane.xlu0 %110 }
 0x172   :  { %v112_v20 = vsub.f32 %v107_v16, %v111_v19 }
 0x174   :  { %v113_v21 = vmul.f32 1.442695, %v112_v20 }
 0x176   :  { %172 = vpow2.f32 %v113_v21 }
 0x180   :  { %v173_v22 = vpop.eup %172 }
 0x181   :  { %v115_v23 = vsel %vm108_vm2, %v173_v22, 0.0 }
 0x182   :  { %116 = vadd.xlane.f32.xlu0 %v115_v23 }
 0x20f   :  { %v117_v24 = vpop.xlane.xlu0 %116 }
 0x210   :  { %174 = vrcp.f32 %v117_v24 }
 0x21a   :  { %v175_v25 = vpop.eup %174 }
 0x21b   :  { %v119_v26 = vmul.f32 %v175_v25, %v173_v22 }
 0x21d   :  { %123 = vrot.lane.b32.xlu1 %v119_v26, %s203_s0 }
 0x28f   :  { %v124_v27 = vpop.permute.xlu1 %123 }
 0x290   :  { %127 = vst.msk [vmem:[#allocation2] sm:$0x3] %vm126_vm5, %v124_v27 }
 0x291   :  { %187 = shalt.err (!%p184_p4)
}
 0x292   :  { %s188_s27 = scalar_lea.hbm %s258_s3, 32 }
 0x293   :  { %p189_p5 = scmp.ne.s32.totalorder %s258_s3, %s188_s27  ;;  %p192_p6 = scmp.lt.u32.totalorder %s188_s27, %s258_s3 }
 0x295   :  { %p194_p7 = pnand %p192_p6, %p189_p5 }
 0x297   :  { %197 = shalt.err (!%p194_p7)
}
 0x298   :  { %137 = dma.vmem_to_hbm [thread:$0]  %s135_s2, 32, %s258_s3, [#allocation3]  }
 0x299   :  { %198 = dma.done.wait [#allocation3], 32  }
 0x29a   :  { %199 = vsyncadd [#allocation3], 4294967264 }
 0x29b   :  { %141 = vsyncpa [#allocation3], 1 }

</bundles_post_ra>
